<compile_context>
chip_gen: v7x
topology: tpu7x:2x2x1
jax: 0.10.0
libtpu: 0.0.40
codegen_flags: <defaults>
</compile_context>

<pallas_src>
import jax
import jax.numpy as jnp
from jax.experimental import pallas as pl
from jax.experimental.pallas import tpu as pltpu


def _make_kernel(B_blk, H, W, C, r):
    WC = W * C                    # lane width of one merged (w, ci) input row
    Q = r * r * W * C             # pixel-shuffled output row width

    def kernel(x_ref, w_ref, b_ref, o_ref, lhs_ref):
        # x_ref:   (B_blk*H, W*C)   f32  lane-merged NHWC input rows
        # w_ref:   (3*W*C, Q)       bf16 banded conv weights, kh bands merged into K,
        #                                output columns in pixel-shuffled (i,w,j,c) order
        # b_ref:   (1, Q)           f32  bias in the same column order
        # o_ref:   (B_blk*H, Q)     f32  pixel-shuffled output rows (lane-dense store)
        # lhs_ref: (B_blk*H, 3*W*C) f32  scratch: [center row | row above | row below]

        # [R4] zero the scratch once; only the 2 border rows / image depend on it.
        @pl.when(pl.program_id(0) == 0)
        def _():
            lhs_ref[...] = jnp.zeros_like(lhs_ref)

        # Assemble the LHS: output row h needs input rows h, h-1, h+1 (missing rows at
        # the image border stay zero from the one-time init).
        for b in range(B_blk):                                   # static, unrolled
            xb = x_ref[b * H:(b + 1) * H, :]
            # kh=1 (center): lane offset 0, no sublane shift -> unmasked copy  [R3]
            lhs_ref[b * H:(b + 1) * H, 0:WC] = xb
            # kh=0 (row above)
            lhs_ref[b * H + 1:(b + 1) * H, WC:2 * WC] = xb[0:H - 1, :]
            # kh=2 (row below)
            lhs_ref[b * H:(b + 1) * H - 1, 2 * WC:3 * WC] = xb[1:H, :]

        # [R2]+[R5] single bf16 matmul with f32 accumulation on the MXU.
        acc = jnp.dot(lhs_ref[...].astype(jnp.bfloat16), w_ref[...],
                      preferred_element_type=jnp.float32)
        acc = acc + b_ref[...]                 # bias (broadcast over rows), f32
        acc = jnp.maximum(acc, 0.0)            # ReLU (commutes with PixelShuffle)
        o_ref[...] = acc.astype(o_ref.dtype)   # lane-dense (Q = 2x128) store

    return kernel


def _banded_shuffled_weights(weight_oihw, bias, W, scale_factor):
    """Fold the kw taps, the kh bands and the PixelShuffle permutation into the weights.

    Returns:
      bigw: (3*W*Cin, r*r*W*C) bf16 -- row index is (band, w_in, ci) with band order
            [center(kh=1), above(kh=0), below(kh=2)]; column index is (i, w, j, c),
            i.e. already the pixel-shuffled NHWC layout of the r output rows produced
            by one conv row.  The conv's zero-pad columns are dropped from the K axis
            (they only ever multiply zeros).
      bvec: (1, r*r*W*C) f32 -- bias permuted/tiled to the same column order.
    """
    Cout, Cin, KH, KW = weight_oihw.shape
    r = scale_factor
    C = Cout // (r * r)

    # OIHW with O = c*r*r + i*r + j  ->  wt[kh, kw, ci, i, j, c]
    wt = jnp.transpose(weight_oihw.reshape(C, r, r, Cin, KH, KW),
                       (4, 5, 3, 1, 2, 0))

    # Band selector over live input columns only: sel[a, w, kw] = (a == w + kw - 1).
    # Out-of-range taps (w + kw - 1 < 0 or >= W) hit the conv's zero padding, so they
    # are simply dropped from the weight matrix.
    a = jnp.arange(W)[:, None, None]
    w = jnp.arange(W)[None, :, None]
    k = jnp.arange(KW)[None, None, :]
    sel = (a == w + k - 1).astype(wt.dtype)                     # (W, W, 3)

    band = jnp.einsum('awk,hkmijc->hamiwjc', sel, wt)           # (kh,a,ci,i,w,j,c)
    band = band.reshape(KH, W * Cin, r * r * W * C)

    # [R2] merge the kh bands into K; the center band goes first so its in-kernel copy
    # is lane- and sublane-aligned.  [R5] stream the weights in bf16.
    bigw = jnp.concatenate([band[1], band[0], band[2]], axis=0).astype(jnp.bfloat16)

    bvec = jnp.transpose(bias.reshape(C, r, r), (1, 2, 0))      # (i, j, c)
    bvec = jnp.broadcast_to(bvec[:, None, :, :], (r, W, r, C))
    bvec = bvec.reshape(1, r * r * W * C).astype(jnp.float32)
    return bigw, bvec


def up_shuffle(x_nchw, weight_oihw, bias, scale_factor=2):
    """Pallas implementation of UpShuffle.forward (NCHW in -> NCHW out)."""
    B, C, H, W = x_nchw.shape
    r = scale_factor
    Cout = C * r * r
    assert weight_oihw.shape == (Cout, C, 3, 3)
    assert bias.shape == (Cout,)
    WC = W * C
    K = 3 * WC
    Q = r * r * WC

    # [R1] fold the batch into the matmul M dimension: pick B_blk so each grid step
    # runs one matmul with M = B_blk*H rows (targets the 256-row MXU of v6e/v7x).
    max_rows = 256
    B_blk = max(1, min(B, max_rows // max(H, 1)))
    while B % B_blk:
        B_blk -= 1
    # [R10] if the batch is big enough, keep >= 2 parallel grid steps (v7x: 2 TCs)
    # without dropping M below a full MXU tile.
    if B // B_blk == 1 and B_blk % 2 == 0 and (B_blk // 2) * H >= 128:
        B_blk //= 2
    n_steps = B // B_blk
    M_blk = B_blk * H

    # Tiny, weight-only preprocessing (would be cached alongside the parameters).
    bigw, bvec = _banded_shuffled_weights(weight_oihw, bias, W, r)

    # Input: NCHW -> NHWC, then merge H into rows and (W, C) onto the lane axis.
    # TODO(synk): this relayout could be folded into the kernel (read a (1,C,H,W)
    # block and einshape in VMEM) to save one small HBM pass over the input.
    x_m = jnp.transpose(x_nchw, (0, 2, 3, 1)).reshape(B * H, WC)

    out_m = pl.pallas_call(
        _make_kernel(B_blk, H, W, C, r),
        out_shape=jax.ShapeDtypeStruct((B * H, Q), x_nchw.dtype),
        grid=(n_steps,),
        in_specs=[
            pl.BlockSpec((M_blk, WC), lambda s: (s, 0)),
            # Grid-invariant weight / bias blocks.
            # TODO(synk): at realistic W, W-tile this block and single-buffer it
            # (pl.Buffered(1)) so it fits v7x's 64 MiB VMEM; trivial at the toy size.
            pl.BlockSpec((K, Q), lambda s: (0, 0)),
            pl.BlockSpec((1, Q), lambda s: (0, 0)),
        ],
        out_specs=pl.BlockSpec((M_blk, Q), lambda s: (s, 0)),
        scratch_shapes=[pltpu.VMEM((M_blk, K), jnp.float32)],
        compiler_params=pltpu.CompilerParams(
            dimension_semantics=("parallel",)),
    )(x_m, bigw, bvec)

    # Row/column order of out_m is (b, h, i, w, j, c): a free reshape yields NHWC;
    # the single remaining post-kernel pass is the NHWC -> NCHW transpose (kept in
    # XLA because W*r = 32 < 128 lanes -- see [R8] note above).
    out_nhwc = out_m.reshape(B, H * r, W * r, C)
    return jnp.transpose(out_nhwc, (0, 3, 1, 2))


def _reference(x_nchw, weight_oihw, bias, scale_factor=2):
    """Pure-JAX reference matching PyTorch Conv2d(pad=1)+PixelShuffle+ReLU semantics."""
    B, C, H, W = x_nchw.shape
    r = scale_factor
    Cout = C * r * r
    conv = jax.lax.conv_general_dilated(
        x_nchw, weight_oihw, window_strides=(1, 1), padding=((1, 1), (1, 1)),
        dimension_numbers=("NCHW", "OIHW", "NCHW"))
    conv = conv + bias.reshape(1, Cout, 1, 1)
    ps = conv.reshape(B, C, r, r, H, W)
    ps = jnp.transpose(ps, (0, 1, 4, 2, 5, 3))
    ps = ps.reshape(B, C, H * r, W * r)
    return jnp.maximum(ps, 0.0)


if __name__ == "__main__":
    key = jax.random.PRNGKey(0)
    B, C, H, W = 2, 4, 16, 16
    scale = 2
    Cout = C * scale * scale

    kx, kw, kb = jax.random.split(key, 3)
    x = jax.random.normal(kx, (B, C, H, W), dtype=jnp.float32)
    weight = 0.1 * jax.random.normal(kw, (Cout, C, 3, 3), dtype=jnp.float32)
    bias = 0.1 * jax.random.normal(kb, (Cout,), dtype=jnp.float32)

    out = up_shuffle(x, weight, bias, scale_factor=scale)
    out = jax.block_until_ready(out)

    ref = _reference(x, weight, bias, scale_factor=scale)
    assert out.shape == (B, C, H * scale, W * scale), out.shape
    # bf16 matmul operands (f32 accumulation): tolerance loosened vs the f32 reference.
    assert jnp.allclose(out, ref, atol=2e-2, rtol=2e-2), "mismatch vs reference"

    print("KERNEL_OK")
</pallas_src>

<mosaic_0001>
module attributes {stable_mosaic.version = 11 : i64} {
  func.func @kernel(%arg0: i32, %arg1: memref<32x64xf32, #tpu.memory_space<vmem>>, %arg2: memref<192x256xbf16, #tpu.memory_space<vmem>>, %arg3: memref<1x256xf32, #tpu.memory_space<vmem>>, %arg4: memref<32x256xf32, #tpu.memory_space<vmem>>, %arg5: memref<32x192xf32, #tpu.memory_space<vmem>>) attributes {dimension_semantics = [#tpu.dimension_semantics<parallel>], iteration_bounds = array<i64: 1>, scalar_prefetch = 0 : i64, scratch_operands = 1 : i64, tpu.core_type = #tpu.core_type<tc>, window_params = [{transform_indices = @transform_0, window_bounds = array<i64: 32, 64>}, {pipeline_mode = #tpu.pipeline_mode<synchronous>, transform_indices = @transform_1, window_bounds = array<i64: 192, 256>}, {pipeline_mode = #tpu.pipeline_mode<synchronous>, transform_indices = @transform_2, window_bounds = array<i64: 1, 256>}, {transform_indices = @transform_3, window_bounds = array<i64: 32, 256>}]} {
    %c0_i32 = arith.constant 0 : i32
    %0 = arith.cmpi eq, %arg0, %c0_i32 : i32
    %1 = arith.extui %0 : i1 to i32
    %c0_i32_0 = arith.constant 0 : i32
    %2 = arith.cmpi ne, %1, %c0_i32_0 : i32
    scf.if %2 {
      %cst_20 = arith.constant 0.000000e+00 : f32
      %25 = vector.broadcast %cst_20 : f32 to vector<32x192xf32>
      %c0_21 = arith.constant 0 : index
      %c0_22 = arith.constant 0 : index
      %26 = vector.load %arg5[%c0_21, %c0_22] : memref<32x192xf32, #tpu.memory_space<vmem>>, vector<32x192xf32>
      tpu.vector_store %arg5[%c0_21, %c0_22], %25 {strides = array<i32>} : memref<32x192xf32, #tpu.memory_space<vmem>>, vector<32x192xf32>,
    } else {
    }
    %c0 = arith.constant 0 : index
    %c0_1 = arith.constant 0 : index
    %3 = vector.load %arg1[%c0, %c0_1] : memref<32x64xf32, #tpu.memory_space<vmem>>, vector<16x64xf32>
    %c0_2 = arith.constant 0 : index
    %c0_3 = arith.constant 0 : index
    %4 = vector.load %arg5[%c0_2, %c0_3] : memref<32x192xf32, #tpu.memory_space<vmem>>, vector<16x64xf32>
    tpu.vector_store %arg5[%c0_2, %c0_3], %3 {strides = array<i32>} : memref<32x192xf32, #tpu.memory_space<vmem>>, vector<16x64xf32>,
    %5 = vector.extract_strided_slice %3 {offsets = [0, 0], sizes = [15, 64], strides = [1, 1]} : vector<16x64xf32> to vector<15x64xf32>
    %c1 = arith.constant 1 : index
    %c64 = arith.constant 64 : index
    %6 = vector.load %arg5[%c1, %c64] : memref<32x192xf32, #tpu.memory_space<vmem>>, vector<15x64xf32>
    tpu.vector_store %arg5[%c1, %c64], %5 {strides = array<i32>} : memref<32x192xf32, #tpu.memory_space<vmem>>, vector<15x64xf32>,
    %7 = vector.extract_strided_slice %3 {offsets = [1, 0], sizes = [15, 64], strides = [1, 1]} : vector<16x64xf32> to vector<15x64xf32>
    %c0_4 = arith.constant 0 : index
    %c128 = arith.constant 128 : index
    %8 = vector.load %arg5[%c0_4, %c128] : memref<32x192xf32, #tpu.memory_space<vmem>>, vector<15x64xf32>
    tpu.vector_store %arg5[%c0_4, %c128], %7 {strides = array<i32>} : memref<32x192xf32, #tpu.memory_space<vmem>>, vector<15x64xf32>,
    %c16 = arith.constant 16 : index
    %c0_5 = arith.constant 0 : index
    %9 = vector.load %arg1[%c16, %c0_5] : memref<32x64xf32, #tpu.memory_space<vmem>>, vector<16x64xf32>
    %c16_6 = arith.constant 16 : index
    %c0_7 = arith.constant 0 : index
    %10 = vector.load %arg5[%c16_6, %c0_7] : memref<32x192xf32, #tpu.memory_space<vmem>>, vector<16x64xf32>
    tpu.vector_store %arg5[%c16_6, %c0_7], %9 {strides = array<i32>} : memref<32x192xf32, #tpu.memory_space<vmem>>, vector<16x64xf32>,
    %11 = vector.extract_strided_slice %9 {offsets = [0, 0], sizes = [15, 64], strides = [1, 1]} : vector<16x64xf32> to vector<15x64xf32>
    %c17 = arith.constant 17 : index
    %c64_8 = arith.constant 64 : index
    %12 = vector.load %arg5[%c17, %c64_8] : memref<32x192xf32, #tpu.memory_space<vmem>>, vector<15x64xf32>
    tpu.vector_store %arg5[%c17, %c64_8], %11 {strides = array<i32>} : memref<32x192xf32, #tpu.memory_space<vmem>>, vector<15x64xf32>,
    %13 = vector.extract_strided_slice %9 {offsets = [1, 0], sizes = [15, 64], strides = [1, 1]} : vector<16x64xf32> to vector<15x64xf32>
    %c16_9 = arith.constant 16 : index
    %c128_10 = arith.constant 128 : index
    %14 = vector.load %arg5[%c16_9, %c128_10] : memref<32x192xf32, #tpu.memory_space<vmem>>, vector<15x64xf32>
    tpu.vector_store %arg5[%c16_9, %c128_10], %13 {strides = array<i32>} : memref<32x192xf32, #tpu.memory_space<vmem>>, vector<15x64xf32>,
    %c0_11 = arith.constant 0 : index
    %c0_12 = arith.constant 0 : index
    %15 = vector.load %arg5[%c0_11, %c0_12] : memref<32x192xf32, #tpu.memory_space<vmem>>, vector<32x192xf32>
    %16 = arith.truncf %15 : vector<32x192xf32> to vector<32x192xbf16>
    %c0_13 = arith.constant 0 : index
    %c0_14 = arith.constant 0 : index
    %17 = vector.load %arg2[%c0_13, %c0_14] : memref<192x256xbf16, #tpu.memory_space<vmem>>, vector<192x256xbf16>
    %cst = arith.constant dense<0.000000e+00> : vector<32x256xf32>
    %18 = tpu.matmul %16, %17, %cst {dimension_numbers = #tpu.dot_dimension_numbers<[1], [0], [0], [1], [0, 0, 1, 1], [], []>} : vector<32x192xbf16>, vector<192x256xbf16>, vector<32x256xf32> -> vector<32x256xf32>
    %c0_15 = arith.constant 0 : index
    %c0_16 = arith.constant 0 : index
    %19 = vector.load %arg3[%c0_15, %c0_16] : memref<1x256xf32, #tpu.memory_space<vmem>>, vector<1x256xf32>
    %20 = vector.broadcast %19 : vector<1x256xf32> to vector<32x256xf32>
    %21 = arith.addf %18, %20 : vector<32x256xf32>
    %cst_17 = arith.constant 0.000000e+00 : f32
    %22 = vector.broadcast %cst_17 : f32 to vector<32x256xf32>
    %23 = arith.maximumf %21, %22 : vector<32x256xf32>
    %c0_18 = arith.constant 0 : index
    %c0_19 = arith.constant 0 : index
    %24 = vector.load %arg4[%c0_18, %c0_19] : memref<32x256xf32, #tpu.memory_space<vmem>>, vector<32x256xf32>
    tpu.vector_store %arg4[%c0_18, %c0_19], %23 {strides = array<i32>} : memref<32x256xf32, #tpu.memory_space<vmem>>, vector<32x256xf32>,
    return
  }
  func.func @transform_0(%arg0: i32) -> (i32, i32) {
    %c0_i32 = arith.constant 0 : i32
    %c0_i32_0 = arith.constant 0 : i32
    return %arg0, %c0_i32 : i32, i32
  }
  func.func @transform_1(%arg0: i32) -> (i32, i32) {
    %c0_i32 = arith.constant 0 : i32
    %c0_i32_0 = arith.constant 0 : i32
    %c0_i32_1 = arith.constant 0 : i32
    return %c0_i32, %c0_i32_0 : i32, i32
  }
  func.func @transform_2(%arg0: i32) -> (i32, i32) {
    %c0_i32 = arith.constant 0 : i32
    %c0_i32_0 = arith.constant 0 : i32
    %c0_i32_1 = arith.constant 0 : i32
    return %c0_i32, %c0_i32_0 : i32, i32
  }
  func.func @transform_3(%arg0: i32) -> (i32, i32) {
    %c0_i32 = arith.constant 0 : i32
    %c0_i32_0 = arith.constant 0 : i32
    return %arg0, %c0_i32 : i32, i32
  }
}

</mosaic_0001>

<bundles_post_ra>
// kernel: tpu_custom_call.1
= control target key start
LH: loop header
LB: loop body
LE: loop exit
PB: predicated region body
PF: predicated region fallthrough
CT: control target
= control target key end

     0   :  { %8 = vsyncpa [#allocation4], 0  ;;  %s625_s0 = inlined_call_operand.hbm [shape: f32[32,64], index: 0, kind: input, shape index: {}]   ;;  %s626_s1 = inlined_call_operand.hbm [shape: bf16[192,256], index: 1, kind: input, shape index: {}]   ;;  %s627_s2 = inlined_call_operand.vmem [shape: f32[1,256], index: 2, kind: input, shape index: {}]   ;;  %s628_s3 = inlined_call_operand.hbm [shape: f32[32,256], index: 3, kind: output, shape index: {}]  }
   0x1   :  { %9 = vsyncpa [#allocation7], 0 }
   0x2   :  { %10 = vsyncpa [#allocation5], 0  ;;  %s539_s12 = smov [#allocation3]   ;;  %s467_s16 = scalar_lea.hbm %s625_s0, 512 }
   0x3   :  { %s16_s13 = sshll.u32 %s539_s12, 4  ;;  %p468_p0 = scmp.ne.s32.totalorder %s625_s0, %s467_s16  ;;  %s17_s13 = int_to_ptr.vmem [resolvable:$true] %s16_s13 }
   0x4   :  { %p471_p1 = scmp.lt.u32.totalorder %s467_s16, %s625_s0 }
   0x6   :  { %p473_p2 = pnand %p471_p1, %p468_p0 }
   0x8   :  { %476 = shalt.err (!%p473_p2)
}
   0x9   :  { %s477_s21 = scalar_lea.vmem %s17_s13, 512  ;;  %p482_p4 = scmp.lt.s32.totalorder %s17_s13, %s17_s13 }
   0xa   :  { %p478_p3 = scmp.ne.s32.totalorder %s17_s13, %s477_s21  ;;  %p483_p5 = scmp.lt.s32.totalorder %s477_s21, %s477_s21 }
   0xc   :  { %p484_p6 = por %p483_p5, %p482_p4 }
   0xe   :  { %p485_p7 = pnand %p484_p6, %p478_p3 }
  0x10   :  { %488 = shalt.err (!%p485_p7)
}
  0x11   :  { %s540_s22 = smov 128   ;;  %s541_s23 = smov 8  }
  0x12   :  { %22 = dma.hbm_to_vmem [thread:$0]  %s625_s0, 512, %s17_s13, [#allocation4], %s540_s22, %s540_s22, %s541_s23  }
  0x13   :  { %s542_s26 = smov [#allocation6]   ;;  %s489_s30 = scalar_lea.hbm %s626_s1, 3072 }
  0x14   :  { %s28_s27 = sshll.u32 %s542_s26, 4  ;;  %p490_p8 = scmp.ne.s32.totalorder %s626_s1, %s489_s30  ;;  %s29_s27 = int_to_ptr.vmem [resolvable:$true] %s28_s27 }
  0x15   :  { %p493_p9 = scmp.lt.u32.totalorder %s489_s30, %s626_s1 }
  0x17   :  { %p495_p10 = pnand %p493_p9, %p490_p8 }
  0x19   :  { %498 = shalt.err (!%p495_p10)
}
  0x1a   :  { %s499_s8 = scalar_lea.vmem %s29_s27, 3072  ;;  %p504_p12 = scmp.lt.s32.totalorder %s29_s27, %s29_s27 }
  0x1b   :  { %p500_p11 = scmp.ne.s32.totalorder %s29_s27, %s499_s8  ;;  %p505_p13 = scmp.lt.s32.totalorder %s499_s8, %s499_s8 }
  0x1d   :  { %p506_p0 = por %p505_p13, %p504_p12 }
  0x1f   :  { %p507_p1 = pnand %p506_p0, %p500_p11 }
  0x21   :  { %510 = shalt.err (!%p507_p1)
}
  0x22   :  { %34 = dma.hbm_to_vmem [thread:$0]  %s626_s1, 3072, %s29_s27, [#allocation7], %s540_s22, %s540_s22, %s541_s23  }
  0x23   :  { %533 = dma.done.wait [#allocation4], 512  }
  0x24   :  { %534 = vsyncadd [#allocation4], 4294966784 }
  0x25   :  { %535 = dma.done.wait [#allocation7], 3072  }
  0x26   :  { %536 = vsyncadd [#allocation7], 4294964224  ;;  %vm49_vm0 = vcmask 523264   ;;  %v543_v0 = vmov 0.0   ;;  %v87_v1 = vld [vmem:[#allocation3 + $0x10] sm:$0xff]  ;;  %v57_v2 = vld [vmem:[#allocation3] sm:$0xff]  ;;  %v149_v57 = vlaneseq }
  0x27   :  { %54 = vst.msk [vmem:[#allocation2 + $0x28] sm:$0xff] %vm49_vm0, %v543_v0  ;;  %56 = vst.msk [vmem:[#allocation2 + $0x38] sm:$0xff] %vm49_vm0, %v543_v0  ;;  %vm64_vm1 = vcmask 1040384   ;;  %vm78_vm2 = vcmask 1046528   ;;  %vm85_vm3 = vcmask 522240   ;;  %v88_v3 = vld [vmem:[#allocation3 + $0x18] sm:$0xff] }
  0x28   :  { %48 = vst [vmem:[#allocation2] sm:$0xff] %v543_v0  ;;  %50 = vst.msk [vmem:[#allocation2 + $0x8] sm:$0xff] %vm49_vm0, %v543_v0  ;;  %v93_v4 = vrot.slane %v87_v1, 7  ;;  %v104_v5 = vrot.slane %v87_v1, 1  ;;  %v65_v6 = vrot.slane %v57_v2, 7  ;;  %v79_v7 = vrot.slane %v57_v2, 1 }
  0x29   :  { %51 = vst [vmem:[#allocation2 + $0x10] sm:$0xff] %v543_v0  ;;  %52 = vst.msk [vmem:[#allocation2 + $0x18] sm:$0xff] %vm49_vm0, %v543_v0  ;;  %v58_v8 = vld [vmem:[#allocation3 + $0x8] sm:$0xff]  ;;  %v94_v9 = vrot.slane %v88_v3, 7  ;;  %v105_v10 = vrot.slane %v88_v3, 1  ;;  %s544_s1 = smov 64  }
  0x2a   :  { %53 = vst [vmem:[#allocation2 + $0x20] sm:$0xff] %v543_v0  ;;  %55 = vst [vmem:[#allocation2 + $0x30] sm:$0xff] %v543_v0  ;;  %v66_v11 = vrot.slane %v58_v8, 7  ;;  %v80_v12 = vrot.slane %v58_v8, 1  ;;  %96 = vrot.lane.b32.xlu1 %v93_v4, %s544_s1  ;;  %68 = vrot.lane.b32.xlu0 %v65_v6, %s544_s1  ;;  %v431_v13 = vld [vmem:[#allocation6 + $0x4] ss:$8 sps:$4 sm:$0xff]  }
  0x2b   :  { %60 = vst.msk [vmem:[#allocation2] sm:$0xff] %vm49_vm0, %v57_v2  ;;  %89 = vst.msk [vmem:[#allocation2 + $0x20] sm:$0xff] %vm49_vm0, %v87_v1  ;;  %v433_v14 = vld [vmem:[#allocation6] ss:$8 sps:$4 sm:$0xff]   ;;  %v95_v15 = vsel %vm64_vm1, %v93_v4, %v94_v9  ;;  %v106_v16 = vsel %vm78_vm2, %v104_v5, %v105_v10  ;;  %v434_v19 = vld [vmem:[#allocation6 + $0x14] ss:$8 sps:$4 sm:$0xff]   ;;  %285 = vmatprep.subr.bf16.mxu0 %v431_v13  ;;  %398 = vmatprep.subr.bf16.mxu1 %v431_v13 }
  0x2c   :  { %90 = vst.msk [vmem:[#allocation2 + $0x30] sm:$0xff] %vm49_vm0, %v88_v3  ;;  %61 = vst.msk [vmem:[#allocation2 + $0x10] sm:$0xff] %vm49_vm0, %v58_v8  ;;  %v67_v17 = vsel %vm64_vm1, %v65_v6, %v66_v11  ;;  %v81_v18 = vsel %vm78_vm2, %v79_v7, %v80_v12  ;;  %286 = vmatpush1.bf16.msra.mxu0 %v433_v14  ;;  %410 = vmatpush1.bf16.msra.mxu1 %v433_v14  ;;  %v436_v20 = vld [vmem:[#allocation6 + $0x10] ss:$8 sps:$4 sm:$0xff]   ;;  %v437_v21 = vld [vmem:[#allocation6 + $0x24] ss:$8 sps:$4 sm:$0xff]  }
  0x2d   :  { %110 = vst.msk [vmem:[#allocation2 + $0x38] sm:$0x7f] %vm85_vm3, %v105_v10  ;;  %86 = vst.msk [vmem:[#allocation2 + $0x18] sm:$0x7f] %vm85_vm3, %v80_v12  ;;  %287 = vmatprep.subr.bf16.mxu0 %v434_v19  ;;  %399 = vmatprep.subr.bf16.mxu1 %v434_v19  ;;  %v439_v22 = vld [vmem:[#allocation6 + $0x20] ss:$8 sps:$4 sm:$0xff]  }
  0x2e   :  { %109 = vst.msk [vmem:[#allocation2 + $0x28] sm:$0xff] %vm49_vm0, %v106_v16  ;;  %84 = vst.msk [vmem:[#allocation2 + $0x8] sm:$0xff] %vm49_vm0, %v81_v18  ;;  %98 = vrot.lane.b32.xlu1 %v95_v15, %s544_s1  ;;  %70 = vrot.lane.b32.xlu0 %v67_v17, %s544_s1  ;;  %v440_v23 = vld [vmem:[#allocation6 + $0x34] ss:$8 sps:$4 sm:$0xff]   ;;  %v442_v24 = vld [vmem:[#allocation6 + $0x30] ss:$8 sps:$4 sm:$0xff]  }
  0x2f   :  { %v443_v25 = vld [vmem:[#allocation6 + $0x44] ss:$8 sps:$4 sm:$0xff]   ;;  %v445_v26 = vld [vmem:[#allocation6 + $0x40] ss:$8 sps:$4 sm:$0xff]   ;;  %v446_v30 = vld [vmem:[#allocation6 + $0x54] ss:$8 sps:$4 sm:$0xff]  }
  0x30   :  { %288 = vmatpush1.bf16.msra.mxu0 %v436_v20  ;;  %411 = vmatpush1.bf16.msra.mxu1 %v436_v20  ;;  %v448_v34 = vld [vmem:[#allocation6 + $0x50] ss:$8 sps:$4 sm:$0xff]   ;;  %v449_v35 = vld [vmem:[#allocation6 + $0x64] ss:$8 sps:$4 sm:$0xff]   ;;  %v451_v36 = vld [vmem:[#allocation6 + $0x60] ss:$8 sps:$4 sm:$0xff]  }
  0x31   :  { %289 = vmatprep.subr.bf16.mxu0 %v437_v21  ;;  %400 = vmatprep.subr.bf16.mxu1 %v437_v21  ;;  %v452_v37 = vld [vmem:[#allocation6 + $0x74] ss:$8 sps:$4 sm:$0xff]   ;;  %v454_v38 = vld [vmem:[#allocation6 + $0x70] ss:$8 sps:$4 sm:$0xff]   ;;  %v455_v39 = vld [vmem:[#allocation6 + $0x84] ss:$8 sps:$4 sm:$0xff]  }
  0x32   :  { %v457_v40 = vld [vmem:[#allocation6 + $0x80] ss:$8 sps:$4 sm:$0xff]   ;;  %v458_v41 = vld [vmem:[#allocation6 + $0x94] ss:$8 sps:$4 sm:$0xff]   ;;  %v460_v42 = vld [vmem:[#allocation6 + $0x90] ss:$8 sps:$4 sm:$0xff]  }
  0x33   :  { %v461_v43 = vld [vmem:[#allocation6 + $0xa4] ss:$8 sps:$4 sm:$0xff]   ;;  %v463_v44 = vld [vmem:[#allocation6 + $0xa0] ss:$8 sps:$4 sm:$0xff]   ;;  %v464_v45 = vld [vmem:[#allocation6 + $0xb4] ss:$8 sps:$4 sm:$0xff]  }
  0x34   :  { %290 = vmatpush1.bf16.msra.mxu0 %v439_v22  ;;  %412 = vmatpush1.bf16.msra.mxu1 %v439_v22  ;;  %v114_v28 = vld [vmem:[#allocation2 + $0x18] sm:$0xff]  ;;  %vm74_vm4 = vcmask 1048065   ;;  %vm76_vm5 = vcmask 1048064   ;;  %v150_v58 = vshrl.u32 %v149_v57, 7  ;;  %v147_v60 = vld [vmem:[%s627_s2] sm:$0x3] }
  0x35   :  { %291 = vmatprep.subr.bf16.mxu0 %v440_v23  ;;  %401 = vmatprep.subr.bf16.mxu1 %v440_v23  ;;  %v112_v27 = vld [vmem:[#allocation2 + $0x8] sm:$0xff]  ;;  %v118_v32 = vld [vmem:[#allocation2 + $0x38] sm:$0xff]  ;;  %s545_s12 = smov [#allocation8]  }
  0x36   :  { %v116_v29 = vld [vmem:[#allocation2 + $0x28] sm:$0xff]  ;;  %v120_v31 = vpack.c.bf16 %v114_v28, %v112_v27  ;;  %v466_v46 = vld [vmem:[#allocation6 + $0xb0] ss:$8 sps:$4 sm:$0xff]   ;;  %v151_v59 = vsub.s32 0, %v150_v58  ;;  %v155_v61 = vsub.s32 1, %v150_v58  ;;  %s359_s13 = sshll.u32 %s545_s12, 4  ;;  %s360_s13 = int_to_ptr.vmem [resolvable:$true] %s359_s13 }
  0x37   :  { %v122_v33 = vpack.c.bf16 %v118_v32, %v116_v29  ;;  %s511_s2 = scalar_lea.vmem %s360_s13, 1024  ;;  %p516_p3 = scmp.lt.s32.totalorder %s360_s13, %s360_s13 }
  0x38   :  { %292 = vmatpush1.bf16.msra.mxu0 %v442_v24  ;;  %413 = vmatpush1.bf16.msra.mxu1 %v442_v24  ;;  %v152_v62 = vrot.slane %v147_v60, %v151_v59  ;;  %v156_v63 = vrot.slane %v147_v60, %v155_v61  ;;  %p512_p2 = scmp.ne.s32.totalorder %s360_s13, %s511_s2  ;;  %p517_p4 = scmp.lt.s32.totalorder %s511_s2, %s511_s2 }
  0x39   :  { %293 = vmatprep.subr.bf16.mxu0 %v443_v25  ;;  %402 = vmatprep.subr.bf16.mxu1 %v443_v25 }
  0x3a   :  { %396 = vmatprep.mubr.msk.bf16.mxu0 %vm49_vm0, %v120_v31  ;;  %397 = vmatprep.mubr.msk.bf16.mxu1 %vm49_vm0, %v122_v33  ;;  %p518_p5 = por %p517_p4, %p516_p3 }
  0x3c   :  { %294 = vmatpush1.bf16.msra.mxu0 %v445_v26  ;;  %414 = vmatpush1.bf16.msra.mxu1 %v445_v26  ;;  %p519_p6 = pnand %p518_p5, %p512_p2 }
  0x3d   :  { %295 = vmatprep.subr.bf16.mxu0 %v446_v30  ;;  %403 = vmatprep.subr.bf16.mxu1 %v446_v30 }
  0x40   :  { %296 = vmatpush1.bf16.msra.mxu0 %v448_v34  ;;  %415 = vmatpush1.bf16.msra.mxu1 %v448_v34 }
  0x41   :  { %297 = vmatprep.subr.bf16.mxu0 %v449_v35  ;;  %404 = vmatprep.subr.bf16.mxu1 %v449_v35 }
  0x44   :  { %298 = vmatpush1.bf16.msra.mxu0 %v451_v36  ;;  %416 = vmatpush1.bf16.msra.mxu1 %v451_v36 }
  0x45   :  { %299 = vmatprep.subr.bf16.mxu0 %v452_v37  ;;  %405 = vmatprep.subr.bf16.mxu1 %v452_v37 }
  0x48   :  { %300 = vmatpush1.bf16.msra.mxu0 %v454_v38  ;;  %417 = vmatpush1.bf16.msra.mxu1 %v454_v38 }
  0x49   :  { %301 = vmatprep.subr.bf16.mxu0 %v455_v39  ;;  %406 = vmatprep.subr.bf16.mxu1 %v455_v39 }
  0x4c   :  { %302 = vmatpush1.bf16.msra.mxu0 %v457_v40  ;;  %418 = vmatpush1.bf16.msra.mxu1 %v457_v40 }
  0x4d   :  { %303 = vmatprep.subr.bf16.mxu0 %v458_v41  ;;  %407 = vmatprep.subr.bf16.mxu1 %v458_v41 }
  0x50   :  { %304 = vmatpush1.bf16.msra.mxu0 %v460_v42  ;;  %419 = vmatpush1.bf16.msra.mxu1 %v460_v42 }
  0x51   :  { %305 = vmatprep.subr.bf16.mxu0 %v461_v43  ;;  %408 = vmatprep.subr.bf16.mxu1 %v461_v43 }
  0x54   :  { %306 = vmatpush1.bf16.msra.mxu0 %v463_v44  ;;  %420 = vmatpush1.bf16.msra.mxu1 %v463_v44 }
  0x55   :  { %307 = vmatprep.subr.bf16.mxu0 %v464_v45  ;;  %409 = vmatprep.subr.bf16.mxu1 %v464_v45 }
  0x58   :  { %308 = vmatpush1.bf16.msra.mxu0 %v466_v46  ;;  %421 = vmatpush1.bf16.msra.mxu1 %v466_v46 }
  0x9c   :  { %v97_v47 = vpop.permute.xlu1 %96  ;;  %v69_v48 = vpop.permute.xlu0 %68 }
  0x9d   :  { %102 = vst.msk [vmem:[#allocation2 + $0x20] sm:$0xfe] %vm74_vm4, %v97_v47  ;;  %75 = vst.msk [vmem:[#allocation2] sm:$0xfe] %vm74_vm4, %v69_v48 }
  0xa0   :  { %v99_v49 = vpop.permute.xlu1 %98  ;;  %v71_v50 = vpop.permute.xlu0 %70 }
  0xa1   :  { %103 = vst.msk [vmem:[#allocation2 + $0x30] sm:$0xff] %vm76_vm5, %v99_v49  ;;  %77 = vst.msk [vmem:[#allocation2 + $0x10] sm:$0xff] %vm76_vm5, %v71_v50 }
  0xa4   :  { %v111_v51 = vld [vmem:[#allocation2] sm:$0xff] }
  0xa5   :  { %v115_v53 = vld [vmem:[#allocation2 + $0x20] sm:$0xff] }
  0xa8   :  { %v113_v52 = vld [vmem:[#allocation2 + $0x10] sm:$0xff] }
  0xa9   :  { %v117_v54 = vld [vmem:[#allocation2 + $0x30] sm:$0xff]  ;;  %v119_v55 = vpack.c.bf16 %v113_v52, %v111_v51 }
  0xaa   :  { %v121_v56 = vpack.c.bf16 %v117_v54, %v115_v53 }
  0xab   :  { %318 = vmatmul.mubr.bf16.vlgmr.msra.gmra.mrb[0].mxu0 %v119_v55 }
  0xac   :  { %328 = vmatmul.mubr.bf16.vlgmr.msra.gmra.mrb[0].mxu1 %v121_v56 }
 0x17e   :  { %v319_v0 = vpop.f32.mrb[0].mxu0 }
 0x17f   :  { %v329_v1 = vpop.f32.mrb[0].mxu1  ;;  %v320_v2 = vadd.f32 %v319_v0, %v152_v62  ;;  %v321_v4 = vpop.f32.mrb[1].mxu0 }
 0x180   :  { %v330_v3 = vadd.f32 %v329_v1, %v152_v62  ;;  %v331_v5 = vpop.f32.mrb[1].mxu1  ;;  %v322_v6 = vadd.f32 %v321_v4, %v156_v63  ;;  %v323_v8 = vpop.f32.mrb[2].mxu0 }
 0x181   :  { %v332_v7 = vadd.f32 %v331_v5, %v156_v63  ;;  %v333_v9 = vpop.f32.mrb[2].mxu1  ;;  %v338_v10 = vmax.f32 %v320_v2, 0.0  ;;  %v324_v12 = vadd.f32 %v323_v8, %v152_v62  ;;  %v325_v14 = vpop.f32.mrb[3].mxu0 }
 0x182   :  { %v342_v11 = vmax.f32 %v330_v3, 0.0  ;;  %v334_v13 = vadd.f32 %v333_v9, %v152_v62  ;;  %v335_v15 = vpop.f32.mrb[3].mxu1  ;;  %v339_v16 = vmax.f32 %v322_v6, 0.0  ;;  %v326_v18 = vadd.f32 %v325_v14, %v156_v63 }
 0x183   :  { %v343_v17 = vmax.f32 %v332_v7, 0.0  ;;  %v336_v19 = vadd.f32 %v335_v15, %v156_v63  ;;  %346 = vst [vmem:[#allocation8] sm:$0xff] %v338_v10  ;;  %v340_v20 = vmax.f32 %v324_v12, 0.0 }
 0x184   :  { %350 = vst [vmem:[#allocation8 + $0x20] sm:$0xff] %v342_v11  ;;  %v344_v21 = vmax.f32 %v334_v13, 0.0  ;;  %347 = vst [vmem:[#allocation8 + $0x8] sm:$0xff] %v339_v16  ;;  %v341_v22 = vmax.f32 %v326_v18, 0.0 }
 0x185   :  { %351 = vst [vmem:[#allocation8 + $0x28] sm:$0xff] %v343_v17  ;;  %v345_v23 = vmax.f32 %v336_v19, 0.0  ;;  %348 = vst [vmem:[#allocation8 + $0x10] sm:$0xff] %v340_v20 }
 0x186   :  { %352 = vst [vmem:[#allocation8 + $0x30] sm:$0xff] %v344_v21  ;;  %349 = vst [vmem:[#allocation8 + $0x18] sm:$0xff] %v341_v22 }
 0x187   :  { %353 = vst [vmem:[#allocation8 + $0x38] sm:$0xff] %v345_v23 }
 0x188   :  { %522 = shalt.err (!%p519_p6)
}
 0x189   :  { %s523_s16 = scalar_lea.hbm %s628_s3, 1024 }
 0x18a   :  { %p524_p7 = scmp.ne.s32.totalorder %s628_s3, %s523_s16  ;;  %p527_p8 = scmp.lt.u32.totalorder %s523_s16, %s628_s3 }
 0x18c   :  { %p529_p9 = pnand %p527_p8, %p524_p7 }
 0x18e   :  { %532 = shalt.err (!%p529_p9)
}
 0x18f   :  { %s546_s21 = smov 256   ;;  %s547_s22 = smov 16  }
 0x190   :  { %365 = dma.vmem_to_hbm [thread:$0]  %s360_s13, 1024, %s628_s3, [#allocation5], %s546_s21, %s546_s21, %s547_s22  }
 0x191   :  { %537 = dma.done.wait [#allocation5], 1024  }
 0x192   :  { %538 = vsyncadd [#allocation5], 4294966272 }
 0x193   :  { %369 = vsyncpa [#allocation4], 1 }
 0x194   :  { %370 = vsyncpa [#allocation7], 1 }
 0x195   :  { %371 = vsyncpa [#allocation5], 1 }

</bundles_post_ra>
